<compile_context>
chip_gen: v6e
topology: v6e:2x2x1
jax: 0.10.0
libtpu: 0.0.40
codegen_flags: <defaults>
</compile_context>

<pallas_src>
import functools

import jax
import jax.numpy as jnp
from jax import lax
from jax.experimental import pallas as pl
from jax.experimental.pallas import tpu as pltpu

MARGIN = 2.0
EPS = 1e-6  # F.pairwise_distance default eps


def _contrastive_sum_kernel(x1_ref, x2_ref, lab_ref, out_ref, *,
                            batch, block_rows, blocks_per_partial, margin):
    p = pl.program_id(0)          # partial (TensorCore) index
    i = pl.program_id(1)          # reduction step within this partial

    @pl.when(i == 0)
    def _():
        out_ref[...] = jnp.zeros_like(out_ref)

    # Unclamped global block index -> first global row of this tile (used only
    # for masking; the index_map clamps the actual DMA to a valid block).
    block_idx = p * blocks_per_partial + i
    row0 = block_idx * block_rows
    row_ids = lax.broadcasted_iota(jnp.int32, (block_rows, 1), 0) + row0
    valid = row_ids < batch                                     # (TB, 1) bool

    x1 = x1_ref[...].astype(jnp.float32)                        # (TB, D)
    x2 = x2_ref[...].astype(jnp.float32)                        # (TB, D)
    lab = lab_ref[...].astype(jnp.float32)                      # (TB, 1)

    diff = x1 - x2 + EPS                                        # (TB, D)  VPU
    sq = jnp.sum(diff * diff, axis=-1, keepdims=True)           # (TB, 1)  XLU reduce
    dist = jnp.sqrt(sq)                                         # (TB, 1)  EUP

    # Match PyTorch's pow(sqrt(x), 2) for the similar-pair term.
    per_row = (1.0 - lab) * (dist * dist) + lab * (margin - dist) ** 2
    # Mask out rows past the true batch (tail padding / clamped re-reads).
    # jnp.where is a select, so garbage/NaN in masked rows cannot leak through.
    per_row = jnp.where(valid, per_row, 0.0)                    # (TB, 1)
    tile_sum = jnp.sum(per_row)                                 # scalar

    out_ref[...] = out_ref[...] + tile_sum


def _pick_block_rows(batch, feat, itemsize, vmem_budget_bytes=24 * 1024 * 1024):
    """Largest sublane-aligned row tile whose double-buffered inputs fit budget."""
    per_row = 2 * 2 * max(feat, 1) * itemsize   # 2 feature inputs x 2 pipeline bufs
    tb = int(vmem_budget_bytes // per_row)
    if tb >= batch:
        return batch                            # single tile: full dim is legal
    return max(8, (tb // 8) * 8)


def _reference(output1, output2, label, *, margin=MARGIN):
    diff = output1.astype(jnp.float32) - output2.astype(jnp.float32) + EPS
    d = jnp.sqrt(jnp.sum(diff * diff, axis=-1))
    lab = label.reshape(-1).astype(jnp.float32)
    return jnp.mean((1.0 - lab) * d ** 2 + lab * (margin - d) ** 2)


def contrastive_loss(output1, output2, label, *, margin=MARGIN,
                     block_rows=None, use_pallas=None):
    """output1, output2: (B, D) f32/bf16; label: (B,) or (B, 1). Returns scalar f32."""
    B, D = output1.shape

    if use_pallas is None:
        # Launch + per-step overhead dwarfs the data movement at toy sizes.
        use_pallas = B * D >= 16384
    if not use_pallas:
        return _reference(output1, output2, label, margin=margin)

    label2d = label.reshape(B, 1).astype(jnp.float32)
    itemsize = jnp.dtype(output1.dtype).itemsize

    if block_rows is None:
        block_rows = _pick_block_rows(B, D, itemsize)
    if block_rows >= B:
        block_rows = B
    else:
        block_rows = max(8, (block_rows // 8) * 8)

    num_blocks = pl.cdiv(B, block_rows)
    num_partials = 2 if num_blocks >= 2 else 1     # v7x: one partial per TensorCore
    bpp = pl.cdiv(num_blocks, num_partials)

    def in_map(p, i):
        # Clamp so grid points past the end re-read the last block; the kernel
        # masks them to a zero contribution.
        return (jnp.minimum(p * bpp + i, num_blocks - 1), 0)

    kernel = functools.partial(
        _contrastive_sum_kernel,
        batch=B, block_rows=block_rows, blocks_per_partial=bpp,
        margin=float(margin))

    # VMEM: 2 feature inputs x 2 pipeline buffers x tile, plus label tiles + output.
    vmem_needed = 2 * 2 * block_rows * D * itemsize + 2 * 2 * block_rows * 4 + (1 << 20)
    vmem_limit = int(min(48 * 1024 * 1024, max(2 * vmem_needed, 16 * 1024 * 1024)))

    partial_sums = pl.pallas_call(
        kernel,
        out_shape=jax.ShapeDtypeStruct((num_partials, 1, 1), jnp.float32),
        grid=(num_partials, bpp),
        in_specs=[
            pl.BlockSpec((block_rows, D), in_map),
            pl.BlockSpec((block_rows, D), in_map),
            pl.BlockSpec((block_rows, 1), in_map),
        ],
        out_specs=pl.BlockSpec((1, 1, 1), lambda p, i: (p, 0, 0)),
        compiler_params=pltpu.CompilerParams(
            dimension_semantics=("parallel", "arbitrary"),
            vmem_limit_bytes=vmem_limit),
    )(output1, output2, label2d)

    return jnp.sum(partial_sums) / jnp.float32(B)


if __name__ == "__main__":
    key = jax.random.PRNGKey(0)

    # --- Test 1: small single-tile case (original shapes), force the kernel ---
    key, k1, k2, k3 = jax.random.split(key, 4)
    B, D = 8, 32
    o1 = jax.random.normal(k1, (B, D), dtype=jnp.float32)
    o2 = jax.random.normal(k2, (B, D), dtype=jnp.float32)
    lab = jax.random.bernoulli(k3, 0.5, (B,)).astype(jnp.float32)
    loss = contrastive_loss(o1, o2, lab, use_pallas=True)
    jax.block_until_ready(loss)
    ref = _reference(o1, o2, lab)
    assert jnp.allclose(loss, ref, rtol=1e-5, atol=1e-5), (loss, ref)

    # --- Test 2: multi-tile + tail masking + 2 partials (B=28, TB=8 -> 4 blocks) ---
    key, k1, k2, k3 = jax.random.split(key, 4)
    B, D = 28, 256
    o1 = jax.random.normal(k1, (B, D), dtype=jnp.float32)
    o2 = jax.random.normal(k2, (B, D), dtype=jnp.float32)
    lab = jax.random.bernoulli(k3, 0.5, (B,)).astype(jnp.float32)
    loss = contrastive_loss(o1, o2, lab, block_rows=8, use_pallas=True)
    jax.block_until_ready(loss)
    ref = _reference(o1, o2, lab)
    assert jnp.allclose(loss, ref, rtol=1e-5, atol=1e-5), (loss, ref)

    # --- Test 3: bf16 inputs stay bf16 over HBM (halved traffic), f32 math in-kernel ---
    key, k1, k2, k3 = jax.random.split(key, 4)
    B, D = 16, 128
    o1 = jax.random.normal(k1, (B, D), dtype=jnp.float32).astype(jnp.bfloat16)
    o2 = jax.random.normal(k2, (B, D), dtype=jnp.float32).astype(jnp.bfloat16)
    lab = jax.random.bernoulli(k3, 0.5, (B,)).astype(jnp.float32)
    loss = contrastive_loss(o1, o2, lab, block_rows=8, use_pallas=True)
    jax.block_until_ready(loss)
    ref = _reference(o1, o2, lab)
    assert jnp.allclose(loss, ref, rtol=1e-4, atol=1e-4), (loss, ref)

    print("KERNEL_OK")
</pallas_src>

<mosaic_0001>
module attributes {stable_mosaic.version = 11 : i64} {
  func.func @_contrastive_sum_kernel(%arg0: i32, %arg1: i32, %arg2: memref<8x32xf32, #tpu.memory_space<vmem>>, %arg3: memref<8x32xf32, #tpu.memory_space<vmem>>, %arg4: memref<8x1xf32, #tpu.memory_space<vmem>>, %arg5: memref<1x1x1xf32, #tpu.memory_space<vmem>>) attributes {dimension_semantics = [#tpu.dimension_semantics<parallel>, #tpu.dimension_semantics<arbitrary>], iteration_bounds = array<i64: 1, 1>, scalar_prefetch = 0 : i64, scratch_operands = 0 : i64, tpu.core_type = #tpu.core_type<tc>, window_params = [{transform_indices = @transform_0, window_bounds = array<i64: 8, 32>}, {transform_indices = @transform_1, window_bounds = array<i64: 8, 32>}, {transform_indices = @transform_2, window_bounds = array<i64: 8, 1>}, {transform_indices = @transform_3, window_bounds = array<i64: 1, 1, 1>}]} {
    %c0_i32 = arith.constant 0 : i32
    %0 = arith.cmpi eq, %arg1, %c0_i32 : i32
    %1 = arith.extui %0 : i1 to i32
    %c0_i32_0 = arith.constant 0 : i32
    %2 = arith.cmpi ne, %1, %c0_i32_0 : i32
    scf.if %2 {
      %cst_18 = arith.constant 0.000000e+00 : f32
      %40 = vector.broadcast %cst_18 : f32 to vector<1x1x1xf32>
      %c0_19 = arith.constant 0 : index
      %c0_20 = arith.constant 0 : index
      %c0_21 = arith.constant 0 : index
      %41 = vector.load %arg5[%c0_19, %c0_20, %c0_21] : memref<1x1x1xf32, #tpu.memory_space<vmem>>, vector<1x1x1xf32>
      tpu.vector_store %arg5[%c0_19, %c0_20, %c0_21], %40 {strides = array<i32>} : memref<1x1x1xf32, #tpu.memory_space<vmem>>, vector<1x1x1xf32>,
    } else {
    }
    %c1_i32 = arith.constant 1 : i32
    %3 = arith.muli %arg0, %c1_i32 : i32
    %4 = arith.addi %3, %arg1 : i32
    %c8_i32 = arith.constant 8 : i32
    %5 = arith.muli %4, %c8_i32 : i32
    %6 = tpu.iota {dimensions = array<i32: 0>} : vector<8x1xi32>
    %7 = vector.broadcast %5 : i32 to vector<8x1xi32>
    %8 = arith.addi %6, %7 : vector<8x1xi32>
    %c8_i32_1 = arith.constant 8 : i32
    %9 = vector.broadcast %c8_i32_1 : i32 to vector<8x1xi32>
    %10 = arith.cmpi slt, %8, %9 : vector<8x1xi32>
    %c0 = arith.constant 0 : index
    %c0_2 = arith.constant 0 : index
    %11 = vector.load %arg2[%c0, %c0_2] : memref<8x32xf32, #tpu.memory_space<vmem>>, vector<8x32xf32>
    %c0_3 = arith.constant 0 : index
    %c0_4 = arith.constant 0 : index
    %12 = vector.load %arg3[%c0_3, %c0_4] : memref<8x32xf32, #tpu.memory_space<vmem>>, vector<8x32xf32>
    %c0_5 = arith.constant 0 : index
    %c0_6 = arith.constant 0 : index
    %13 = vector.load %arg4[%c0_5, %c0_6] : memref<8x1xf32, #tpu.memory_space<vmem>>, vector<8x1xf32>
    %14 = arith.subf %11, %12 : vector<8x32xf32>
    %cst = arith.constant 9.99999997E-7 : f32
    %15 = vector.broadcast %cst : f32 to vector<8x32xf32>
    %16 = arith.addf %14, %15 : vector<8x32xf32>
    %17 = arith.mulf %16, %16 : vector<8x32xf32>
    %cst_7 = arith.constant dense<0.000000e+00> : vector<8xf32>
    %18 = vector.multi_reduction <add>, %17, %cst_7 [1] : vector<8x32xf32> to vector<8xf32>
    %19 = vector.shape_cast %18 : vector<8xf32> to vector<8x1xf32>
    %20 = math.sqrt %19 : vector<8x1xf32>
    %cst_8 = arith.constant 1.000000e+00 : f32
    %21 = vector.broadcast %cst_8 : f32 to vector<8x1xf32>
    %22 = arith.subf %21, %13 : vector<8x1xf32>
    %23 = arith.mulf %20, %20 : vector<8x1xf32>
    %24 = arith.mulf %22, %23 : vector<8x1xf32>
    %cst_9 = arith.constant 2.000000e+00 : f32
    %25 = vector.broadcast %cst_9 : f32 to vector<8x1xf32>
    %26 = arith.subf %25, %20 : vector<8x1xf32>
    %27 = arith.mulf %26, %26 : vector<8x1xf32>
    %28 = arith.mulf %13, %27 : vector<8x1xf32>
    %29 = arith.addf %24, %28 : vector<8x1xf32>
    %cst_10 = arith.constant 0.000000e+00 : f32
    %30 = vector.broadcast %cst_10 : f32 to vector<8x1xf32>
    %31 = arith.select %10, %29, %30 : vector<8x1xi1>, vector<8x1xf32>
    %32 = vector.shape_cast %31 : vector<8x1xf32> to vector<1x8x1xf32>
    %cst_11 = arith.constant dense<0.000000e+00> : vector<1xf32>
    %33 = vector.multi_reduction <add>, %32, %cst_11 [1, 2] : vector<1x8x1xf32> to vector<1xf32>
    %34 = vector.shape_cast %33 : vector<1xf32> to vector<1x1x1xf32>
    %35 = vector.extract %34[0, 0, 0] : f32 from vector<1x1x1xf32>
    %c0_12 = arith.constant 0 : index
    %c0_13 = arith.constant 0 : index
    %c0_14 = arith.constant 0 : index
    %36 = vector.load %arg5[%c0_12, %c0_13, %c0_14] : memref<1x1x1xf32, #tpu.memory_space<vmem>>, vector<1x1x1xf32>
    %37 = vector.broadcast %35 : f32 to vector<1x1x1xf32>
    %38 = arith.addf %36, %37 : vector<1x1x1xf32>
    %c0_15 = arith.constant 0 : index
    %c0_16 = arith.constant 0 : index
    %c0_17 = arith.constant 0 : index
    %39 = vector.load %arg5[%c0_15, %c0_16, %c0_17] : memref<1x1x1xf32, #tpu.memory_space<vmem>>, vector<1x1x1xf32>
    tpu.vector_store %arg5[%c0_15, %c0_16, %c0_17], %38 {strides = array<i32>} : memref<1x1x1xf32, #tpu.memory_space<vmem>>, vector<1x1x1xf32>,
    return
  }
  func.func @transform_0(%arg0: i32, %arg1: i32) -> (i32, i32) {
    %c1_i32 = arith.constant 1 : i32
    %0 = arith.muli %arg0, %c1_i32 : i32
    %1 = arith.addi %0, %arg1 : i32
    %c0_i32 = arith.constant 0 : i32
    %2 = arith.minsi %1, %c0_i32 : i32
    %c0_i32_0 = arith.constant 0 : i32
    %c0_i32_1 = arith.constant 0 : i32
    return %2, %c0_i32_0 : i32, i32
  }
  func.func @transform_1(%arg0: i32, %arg1: i32) -> (i32, i32) {
    %c1_i32 = arith.constant 1 : i32
    %0 = arith.muli %arg0, %c1_i32 : i32
    %1 = arith.addi %0, %arg1 : i32
    %c0_i32 = arith.constant 0 : i32
    %2 = arith.minsi %1, %c0_i32 : i32
    %c0_i32_0 = arith.constant 0 : i32
    %c0_i32_1 = arith.constant 0 : i32
    return %2, %c0_i32_0 : i32, i32
  }
  func.func @transform_2(%arg0: i32, %arg1: i32) -> (i32, i32) {
    %c1_i32 = arith.constant 1 : i32
    %0 = arith.muli %arg0, %c1_i32 : i32
    %1 = arith.addi %0, %arg1 : i32
    %c0_i32 = arith.constant 0 : i32
    %2 = arith.minsi %1, %c0_i32 : i32
    %c0_i32_0 = arith.constant 0 : i32
    %c0_i32_1 = arith.constant 0 : i32
    return %2, %c0_i32_0 : i32, i32
  }
  func.func @transform_3(%arg0: i32, %arg1: i32) -> (i32, i32, i32) {
    %c0_i32 = arith.constant 0 : i32
    %c0_i32_0 = arith.constant 0 : i32
    %c0_i32_1 = arith.constant 0 : i32
    return %arg0, %c0_i32, %c0_i32_0 : i32, i32, i32
  }
}

</mosaic_0001>

<bundles_post_ra>
// kernel: tpu_custom_call.1
= control target key start
LH: loop header
LB: loop body
LE: loop exit
PB: predicated region body
PF: predicated region fallthrough
CT: control target
= control target key end

     0   :  { %8 = vsyncpa [#allocation3], 0  ;;  %s260_s0 = inlined_call_operand.vmem [shape: f32[8,32], index: 0, kind: input, shape index: {}]   ;;  %s261_s1 = inlined_call_operand.hbm [shape: f32[8,32], index: 1, kind: input, shape index: {}]   ;;  %s262_s2 = inlined_call_operand.vmem [shape: f32[8,1], index: 2, kind: input, shape index: {}]   ;;  %s263_s3 = inlined_call_operand.hbm [shape: f32[1,1,1], index: 3, kind: output, shape index: {}]  }
   0x1   :  { %9 = vsyncpa [#allocation4], 0  ;;  %s223_s12 = smov [#allocation2]  }
   0x2   :  { %s33_s13 = sshll.u32 %s223_s12, 4  ;;  %s34_s13 = int_to_ptr.vmem [resolvable:$true] %s33_s13 }
   0x3   :  { %s187_s14 = scalar_lea.vmem %s34_s13, 128  ;;  %p192_p1 = scmp.lt.s32.totalorder %s34_s13, %s34_s13 }
   0x4   :  { %p188_p0 = scmp.ne.s32.totalorder %s34_s13, %s187_s14  ;;  %p193_p2 = scmp.lt.s32.totalorder %s187_s14, %s187_s14 }
   0x6   :  { %p194_p3 = por %p193_p2, %p192_p1 }
   0x8   :  { %p195_p4 = pnand %p194_p3, %p188_p0 }
   0xa   :  { %198 = shalt.err (!%p195_p4)
}
   0xb   :  { %36 = dma.hbm_to_vmem [thread:$0]  %s261_s1, 128, %s34_s13, [#allocation3]  }
   0xc   :  { %219 = dma.done.wait [#allocation3], 128  }
   0xd   :  { %220 = vsyncadd [#allocation3], 4294967168  ;;  %vm93_vm0 = vcmask 0   ;;  %v224_v0 = vmov 0.0   ;;  %v102_v1 = vld [vmem:[%s260_s0] sm:$0xff]  ;;  %vm108_vm1 = vcmask 261120  }
   0xe   :  { %94 = vst.msk [vmem:[#allocation5] sm:$0x1] %vm93_vm0, %v224_v0  ;;  %v103_v2 = vld [vmem:[#allocation2] sm:$0xff]  ;;  %vm127_vm4 = vcmask 7168   ;;  %s225_s0 = smov [#allocation5]  }
   0xf   :  { %v105_v3 = vsub.f32 %v102_v1, %v103_v2  ;;  %v104_v11 = vld [vmem:[%s262_s2] sm:$0xff]  ;;  %s149_s2 = sshll.u32 %s225_s0, 4  ;;  %s150_s2 = int_to_ptr.vmem [resolvable:$true] %s149_s2 }
  0x10   :  { %v119_v14 = vsub.f32 1.0, %v104_v11  ;;  %s199_s21 = scalar_lea.vmem %s150_s2, 16  ;;  %s203_s22 = scalar_lea.vmem %s150_s2, 32 }
  0x11   :  { %v106_v4 = vadd.f32 1e-06, %v105_v3  ;;  %p200_p5 = scmp.ne.s32.totalorder %s150_s2, %s199_s21  ;;  %p204_p6 = scmp.lt.s32.totalorder %s150_s2, %s150_s2 }
  0x12   :  { %p205_p7 = scmp.lt.s32.totalorder %s203_s22, %s199_s21 }
  0x13   :  { %v107_v5 = vmul.f32 %v106_v4, %v106_v4 }
  0x14   :  { %p206_p8 = por %p205_p7, %p204_p6 }
  0x15   :  { %v109_v6 = vsel %vm108_vm1, %v107_v5, 0.0  ;;  %v138_v29 = vld [vmem:[#allocation5] sm:$0x1] }
  0x16   :  { %110 = vadd.xlane.f32.xlu0 %v109_v6  ;;  %p207_p9 = pnand %p206_p8, %p200_p5 }
  0x9f   :  { %v111_v7 = vpop.xlane.xlu0 %110 }
  0xa0   :  { %177 = vrsqrt.f32 %v111_v7  ;;  %vm114_vm2 = vcmp.eq.f32.partialorder %v111_v7, inf  ;;  %v117_v10 = vand.u32 2147483648, %v111_v7  ;;  %vm116_vm3 = vcmp.eq.f32.partialorder %v111_v7, 0.0 }
  0xad   :  { %v178_v8 = vpop.eup %177 }
  0xae   :  { %v113_v9 = vmul.f32 %v178_v8, %v111_v7 }
  0xb0   :  { %v115_v12 = vsel %vm114_vm2, %v111_v7, %v113_v9 }
  0xb1   :  { %v118_v13 = vsel %vm116_vm3, %v117_v10, %v115_v12 }
  0xb2   :  { %v120_v15 = vmul.f32 %v118_v13, %v118_v13  ;;  %v122_v16 = vsub.f32 2.0, %v118_v13 }
  0xb4   :  { %v123_v17 = vmul.f32 %v122_v16, %v122_v16  ;;  %v121_v18 = vmul.f32 %v120_v15, %v119_v14 }
  0xb6   :  { %v124_v19 = vmul.f32 %v123_v17, %v104_v11 }
  0xb8   :  { %v125_v20 = vadd.f32 %v124_v19, %v121_v18 }
  0xba   :  { %v128_v21 = vsel %vm127_vm4, %v125_v20, 0.0 }
  0xbb   :  { %129 = vadd.xlane.f32.xlu0 %v128_v21 }
 0x144   :  { %v130_v22 = vpop.xlane.xlu0 %129 }
 0x145   :  { %v131_v23 = vrot.slane %v130_v22, 4 }
 0x147   :  { %v132_v24 = vadd.f32 %v131_v23, %v130_v22 }
 0x149   :  { %v133_v25 = vrot.slane %v132_v24, 2 }
 0x14b   :  { %v134_v26 = vadd.f32 %v133_v25, %v132_v24 }
 0x14d   :  { %v135_v27 = vrot.slane %v134_v26, 1 }
 0x14f   :  { %v136_v28 = vadd.f32 %v135_v27, %v134_v26 }
 0x151   :  { %172 = vpush %v136_v28 }
 0x182   :  { %s173_s20 = spop %172 }
 0x183   :  { %v139_v30 = vstv %s173_s20 }
 0x184   :  { %v140_v31 = vadd.f32 %v139_v30, %v138_v29 }
 0x186   :  { %142 = vst.msk [vmem:[#allocation5] sm:$0x1] %vm93_vm0, %v140_v31 }
 0x187   :  { %210 = shalt.err (!%p207_p9)
}
 0x188   :  { %152 = dma.vmem_to_hbm [thread:$0]  %s150_s2, 16, %s263_s3, [#allocation4]  }
 0x189   :  { %221 = dma.done.wait [#allocation4], 16  }
 0x18a   :  { %222 = vsyncadd [#allocation4], 4294967280 }
 0x18b   :  { %156 = vsyncpa [#allocation3], 1 }
 0x18c   :  { %157 = vsyncpa [#allocation4], 1 }

</bundles_post_ra>
